<compile_context>
chip_gen: v5e
topology: v5e:2x2
jax: 0.10.0
libtpu: 0.0.40
codegen_flags: <defaults>
</compile_context>

<pallas_src>
import jax
import jax.numpy as jnp
from jax.experimental import pallas as pl
from jax.experimental.pallas import tpu as pltpu


P_DROP = 0.3
LANE = 128


# ---------------------------------------------------------------------------
# Kernels
# ---------------------------------------------------------------------------
def _classifier_eval_kernel(x_ref, wt_ref, b_ref, o_ref):
    # x_ref : [TB, F]      bf16
    # wt_ref: [F, C_pad]   bf16 (pre-transposed PyTorch weight, zero-padded)
    # b_ref : [1, C_pad]   f32  (zero-padded)
    # o_ref : [TB, C_pad]  f32
    y = jnp.dot(x_ref[...], wt_ref[...], preferred_element_type=jnp.float32)
    o_ref[...] = (y + b_ref[...]).astype(o_ref.dtype)


def _classifier_train_kernel(x_ref, wt_ref, b_ref, m_ref, o_ref):
    # m_ref : [TB, C_pad] f32 inverted-dropout scale mask (0 or 1/(1-p))
    y = jnp.dot(x_ref[...], wt_ref[...], preferred_element_type=jnp.float32)
    y = (y + b_ref[...]) * m_ref[...]
    o_ref[...] = y.astype(o_ref.dtype)


# ---------------------------------------------------------------------------
# Parameter preparation (done once, outside the hot forward path)
# ---------------------------------------------------------------------------
def prepare_params(weight, bias):
    """weight: [C, F] (PyTorch Linear layout), bias: [C].

    Returns (w_t_pad [F, C_pad] bf16, b_pad [1, C_pad] f32, C)."""
    C, F = weight.shape
    C_pad = ((C + LANE - 1) // LANE) * LANE
    w_t_pad = jnp.zeros((F, C_pad), dtype=jnp.bfloat16)
    w_t_pad = w_t_pad.at[:, :C].set(weight.T.astype(jnp.bfloat16))
    b_pad = jnp.zeros((1, C_pad), dtype=jnp.float32)
    b_pad = b_pad.at[:, :C].set(bias.astype(jnp.float32))
    return w_t_pad, b_pad, C


# ---------------------------------------------------------------------------
# Forward wrapper
# ---------------------------------------------------------------------------
def classifier_forward(x, w_t_pad, b_pad, class_num, *, training=False, rng=None):
    """x: [B, F] float; returns [B, class_num] float32."""
    B, F = x.shape
    C_pad = w_t_pad.shape[1]

    # bf16 activations for the MXU / halved HBM->VMEM traffic.
    x_bf = x.astype(jnp.bfloat16)

    # Batch tile: full B for small batches (block == full dim is always legal),
    # otherwise 256 rows (multiple of 8 sublanes, good for v5e/v6e/v7x MXU).
    TB = B if B <= 256 else 256
    grid = (pl.cdiv(B, TB),)

    in_specs = [
        pl.BlockSpec((TB, F), lambda i: (i, 0)),        # x tile, streams over B
        pl.BlockSpec((F, C_pad), lambda i: (0, 0)),     # weight, resident
        pl.BlockSpec((1, C_pad), lambda i: (0, 0)),     # bias, resident
    ]
    out_spec = pl.BlockSpec((TB, C_pad), lambda i: (i, 0))

    if training:
        if rng is None:
            rng = jax.random.PRNGKey(0)
        keep = jax.random.bernoulli(rng, 1.0 - P_DROP, (B, C_pad))
        mask = keep.astype(jnp.float32) * jnp.float32(1.0 / (1.0 - P_DROP))
        in_specs.append(pl.BlockSpec((TB, C_pad), lambda i: (i, 0)))
        kernel = _classifier_train_kernel
        args = (x_bf, w_t_pad, b_pad, mask)
    else:
        kernel = _classifier_eval_kernel
        args = (x_bf, w_t_pad, b_pad)

    out = pl.pallas_call(
        kernel,
        out_shape=jax.ShapeDtypeStruct((B, C_pad), jnp.float32),
        grid_spec=pltpu.PrefetchScalarGridSpec(
            num_scalar_prefetch=0,
            grid=grid,
            in_specs=in_specs,
            out_specs=out_spec,
        ),
        compiler_params=pltpu.CompilerParams(
            dimension_semantics=("parallel",)),
    )(*args)

    # Slice the lane-padding away; padded columns are exactly zero by
    # construction (zero weight columns + zero bias entries).
    return out[:, :class_num]


# ---------------------------------------------------------------------------
# Demo / self-test
# ---------------------------------------------------------------------------
if __name__ == "__main__":
    # Module hyper-parameters (small, consistent with __init__ signature):
    lstm_hidden_dim = 8
    K = 4
    class_num = 10
    batch = 2
    in_features = K * lstm_hidden_dim  # 32

    key = jax.random.PRNGKey(0)
    kx, kw, kb, kd = jax.random.split(key, 4)

    # Deterministic synthetic parameters (PyTorch Linear layout: [out, in]).
    x = jax.random.normal(kx, (batch, in_features), dtype=jnp.float32)
    bound = 1.0 / (in_features ** 0.5)
    weight = jax.random.uniform(kw, (class_num, in_features),
                                minval=-bound, maxval=bound, dtype=jnp.float32)
    bias = jax.random.uniform(kb, (class_num,),
                              minval=-bound, maxval=bound, dtype=jnp.float32)

    # One-time parameter prep (transpose + pad + bf16 cast), outside hot path.
    w_t_pad, b_pad, _ = prepare_params(weight, bias)

    # Eval-mode forward (dropout = identity), matching model.eval() inference.
    out = classifier_forward(x, w_t_pad, b_pad, class_num, training=False)
    out = jax.block_until_ready(out)

    # Reference check against plain JAX (f32 reference, bf16 MXU tolerance).
    ref = x @ weight.T + bias
    assert out.shape == (batch, class_num)
    assert jnp.allclose(out, ref, atol=2e-2, rtol=2e-2), "mismatch vs reference"

    # Training-mode path (inverted dropout with host-generated mask).
    out_train = jax.block_until_ready(
        classifier_forward(x, w_t_pad, b_pad, class_num, training=True, rng=kd))
    assert out_train.shape == (batch, class_num)
    assert bool(jnp.all(jnp.isfinite(out_train)))
    # Every training-mode element is either 0 (dropped) or ref/(1-p) (kept).
    scaled_ref = ref / (1.0 - P_DROP)
    match_kept = jnp.abs(out_train - scaled_ref) <= (2e-2 + 2e-2 * jnp.abs(scaled_ref))
    match_drop = out_train == 0.0
    assert bool(jnp.all(match_kept | match_drop)), "dropout semantics mismatch"

    print("KERNEL_OK")
</pallas_src>

<mosaic_0001>
module attributes {stable_mosaic.version = 11 : i64} {
  func.func @_classifier_eval_kernel(%arg0: i32, %arg1: memref<2x32xbf16, #tpu.memory_space<vmem>>, %arg2: memref<32x128xbf16, #tpu.memory_space<vmem>>, %arg3: memref<1x128xf32, #tpu.memory_space<vmem>>, %arg4: memref<2x128xf32, #tpu.memory_space<vmem>>) attributes {dimension_semantics = [#tpu.dimension_semantics<parallel>], iteration_bounds = array<i64: 1>, scalar_prefetch = 0 : i64, scratch_operands = 0 : i64, tpu.core_type = #tpu.core_type<tc>, window_params = [{transform_indices = @transform_0, window_bounds = array<i64: 2, 32>}, {pipeline_mode = #tpu.pipeline_mode<synchronous>, transform_indices = @transform_1, window_bounds = array<i64: 32, 128>}, {pipeline_mode = #tpu.pipeline_mode<synchronous>, transform_indices = @transform_2, window_bounds = array<i64: 1, 128>}, {transform_indices = @transform_3, window_bounds = array<i64: 2, 128>}]} {
    %c0 = arith.constant 0 : index
    %c0_0 = arith.constant 0 : index
    %0 = vector.load %arg1[%c0, %c0_0] : memref<2x32xbf16, #tpu.memory_space<vmem>>, vector<2x32xbf16>
    %c0_1 = arith.constant 0 : index
    %c0_2 = arith.constant 0 : index
    %1 = vector.load %arg2[%c0_1, %c0_2] : memref<32x128xbf16, #tpu.memory_space<vmem>>, vector<32x128xbf16>
    %cst = arith.constant dense<0.000000e+00> : vector<2x128xf32>
    %2 = tpu.matmul %0, %1, %cst {dimension_numbers = #tpu.dot_dimension_numbers<[1], [0], [0], [1], [0, 0, 1, 1], [], []>} : vector<2x32xbf16>, vector<32x128xbf16>, vector<2x128xf32> -> vector<2x128xf32>
    %c0_3 = arith.constant 0 : index
    %c0_4 = arith.constant 0 : index
    %3 = vector.load %arg3[%c0_3, %c0_4] : memref<1x128xf32, #tpu.memory_space<vmem>>, vector<1x128xf32>
    %4 = vector.broadcast %3 : vector<1x128xf32> to vector<2x128xf32>
    %5 = arith.addf %2, %4 : vector<2x128xf32>
    %c0_5 = arith.constant 0 : index
    %c0_6 = arith.constant 0 : index
    %6 = vector.load %arg4[%c0_5, %c0_6] : memref<2x128xf32, #tpu.memory_space<vmem>>, vector<2x128xf32>
    tpu.vector_store %arg4[%c0_5, %c0_6], %5 {strides = array<i32>} : memref<2x128xf32, #tpu.memory_space<vmem>>, vector<2x128xf32>,
    return
  }
  func.func @transform_0(%arg0: i32) -> (i32, i32) {
    %c0_i32 = arith.constant 0 : i32
    %c0_i32_0 = arith.constant 0 : i32
    return %arg0, %c0_i32 : i32, i32
  }
  func.func @transform_1(%arg0: i32) -> (i32, i32) {
    %c0_i32 = arith.constant 0 : i32
    %c0_i32_0 = arith.constant 0 : i32
    %c0_i32_1 = arith.constant 0 : i32
    return %c0_i32, %c0_i32_0 : i32, i32
  }
  func.func @transform_2(%arg0: i32) -> (i32, i32) {
    %c0_i32 = arith.constant 0 : i32
    %c0_i32_0 = arith.constant 0 : i32
    %c0_i32_1 = arith.constant 0 : i32
    return %c0_i32, %c0_i32_0 : i32, i32
  }
  func.func @transform_3(%arg0: i32) -> (i32, i32) {
    %c0_i32 = arith.constant 0 : i32
    %c0_i32_0 = arith.constant 0 : i32
    return %arg0, %c0_i32 : i32, i32
  }
}

</mosaic_0001>

<bundles_post_ra>
// kernel: tpu_custom_call.1
= control target key start
LH: loop header
LB: loop body
LE: loop exit
PB: predicated region body
PF: predicated region fallthrough
CT: control target
= control target key end

     0   :  { %8 = vsyncpa [#allocation3], 0  ;;  %s235_s0 = inlined_call_operand.hbm [shape: bf16[2,32], index: 0, kind: input, shape index: {}]   ;;  %s236_s1 = inlined_call_operand.hbm [shape: bf16[32,128], index: 1, kind: input, shape index: {}]   ;;  %s237_s2 = inlined_call_operand.vmem [shape: f32[1,128], index: 2, kind: input, shape index: {}]   ;;  %s238_s3 = inlined_call_operand.hbm [shape: f32[2,128], index: 3, kind: output, shape index: {}]  }
   0x1   :  { %9 = vsyncpa [#allocation6], 0 }
   0x2   :  { %10 = vsyncpa [#allocation4], 0  ;;  %s16_s14 = sshll.u32 %s235_s0, 4  ;;  %s198_s15 = smov [#allocation2]   ;;  %s17_s14 = int_to_ptr.hbm [resolvable:$true] %s16_s14 }
   0x3   :  { %s18_s16 = sshll.u32 %s198_s15, 4  ;;  %s26_s19 = sshll.u32 %s236_s1, 4  ;;  %s19_s16 = int_to_ptr.vmem [resolvable:$true] %s18_s16  ;;  %s27_s19 = int_to_ptr.hbm [resolvable:$true] %s26_s19 }
   0x4   :  { %21 = dma.hbm_to_vmem [thread:$0]  %s17_s14, 16, %s19_s16, [#allocation3]  }
   0x5   :  { %s199_s20 = smov [#allocation5]   ;;  %s200_s22 = smov 64  }
   0x6   :  { %s28_s21 = sshll.u32 %s199_s20, 4  ;;  %s201_s23 = smov 4   ;;  %s29_s21 = int_to_ptr.vmem [resolvable:$true] %s28_s21 }
   0x7   :  { %34 = dma.hbm_to_vmem [thread:$0]  %s27_s19, 256, %s29_s21, [#allocation6], %s200_s22, %s200_s22, %s201_s23  }
   0x8   :  { %192 = dma.done.wait [#allocation3], 16  }
   0x9   :  { %193 = vsyncadd [#allocation3], 4294967280 }
   0xa   :  { %194 = dma.done.wait [#allocation6], 256  }
   0xb   :  { %195 = vsyncadd [#allocation6], 4294967040  ;;  %v113_v0 = vld [vmem:[#allocation5 + $0x8] sm:$0xff]  ;;  %v112_v1 = vld [vmem:[#allocation5] sm:$0xff]  ;;  %vm67_vm0 = vcmask 261120   ;;  %s202_s24 = smov [#allocation7]  }
   0xc   :  { %77 = vmatpush.bf16.msra.mxu0 %v113_v0  ;;  %v46_v2 = vld [vmem:[#allocation2] sm:$0x1]  ;;  %s90_s25 = sshll.u32 %s202_s24, 4  ;;  %s92_s28 = sshll.u32 %s238_s3, 4  ;;  %s91_s25 = int_to_ptr.vmem [resolvable:$true] %s90_s25  ;;  %s93_s28 = int_to_ptr.hbm [resolvable:$true] %s92_s28 }
   0xd   :  { %v119_v3 = vld [vmem:[%s237_s2] ss:$0 sm:$0xff] }
  0x10   :  { %78 = vmatpush.bf16.msra.mxu0 %v112_v1 }
  0x13   :  { %111 = vmatmul.msk.bf16.vlgmr.msra.gmra.mxu0 %vm67_vm0, %v46_v2 }
  0x90   :  { %v80_v4 = vpop.f32.mrf.mxu0 }
  0x91   :  { %v81_v5 = vadd.f32 %v119_v3, %v80_v4 }
  0x93   :  { %84 = vst [vmem:[#allocation7] sm:$0x3] %v81_v5 }
  0x94   :  { %95 = dma.vmem_to_hbm [thread:$0]  %s91_s25, 32, %s93_s28, [#allocation4]  }
  0x98   :  { %v82_v6 = vpop.f32.mrf.mxu0 }
  0x99   :  { %196 = dma.done.wait [#allocation4], 32  }
  0x9a   :  { %197 = vsyncadd [#allocation4], 4294967264 }
  0x9b   :  { %100 = vsyncpa [#allocation3], 1 }
  0x9c   :  { %101 = vsyncpa [#allocation6], 1 }
  0x9d   :  { %102 = vsyncpa [#allocation4], 1 }

</bundles_post_ra>
